<compile_context>
chip_gen: v7x
topology: tpu7x:2x2x1
jax: 0.10.0
libtpu: 0.0.40
codegen_flags: <defaults>
</compile_context>

<pallas_src>
import functools

import jax
import jax.numpy as jnp
from jax.experimental import pallas as pl
from jax.experimental.pallas import tpu as pltpu


def _round_up(n, m):
    return ((n + m - 1) // m) * m


def _mlp_kernel(x_ref, a_ref, w1o_ref, w1a_ref, b1_ref, w2_ref, b2_ref, out_ref):
    """Fused [concat -> Linear -> ReLU -> Linear -> ReLU] on one batch tile.

    The concat is folded into two MXU dots on the split W1 (obs rows / act
    rows) accumulating into one f32 result.  Bias-add / ReLU run in f32; only
    the MXU operands may be bf16.
    """
    h1 = jnp.dot(x_ref[...], w1o_ref[...], preferred_element_type=jnp.float32)
    h1 = h1 + jnp.dot(a_ref[...], w1a_ref[...], preferred_element_type=jnp.float32)
    h1 = jnp.maximum(h1 + b1_ref[...], 0.0)            # b1 is (1, H1) broadcast

    h2 = jnp.dot(h1.astype(w2_ref.dtype), w2_ref[...],
                 preferred_element_type=jnp.float32)
    h2 = jnp.maximum(h2 + b2_ref[...], 0.0)

    out_ref[...] = h2.astype(out_ref.dtype)

    # TODO(synk): if a downstream head (Q/policy linear) is known, fuse it here
    # so the [B, H2] feature never round-trips HBM (it is the dominant byte
    # stream once the matmuls are bf16).


@functools.partial(
    jax.jit,
    static_argnames=("tm", "matmul_dtype", "out_dtype", "discrete_action"))
def vector_encoder_with_action(x, action, params, *, tm=None,
                               matmul_dtype=jnp.bfloat16,
                               out_dtype=jnp.float32,
                               discrete_action=False):
    """JAX wrapper reproducing VectorEncoderWithAction.forward.

    x:      [B, obs_dim]  float32
    action: [B, act_dim]  float32 continuous actions, or [B] / [B,1] int ids
            when discrete_action=True
    params: dict with w1 [obs+act, H1], b1 [1, H1], w2 [H1, H2], b2 [1, H2]
    tm:     batch tile (rows); default picks a sublane-multiple tile up to 1024
            rows with >= 2 grid steps when B allows.
    matmul_dtype: dtype for the MXU operands only (accumulation, bias, ReLU
            stay f32).  Default bf16 (native MXU dtype on v5e/v6e/v7x); pass
            None to keep the input dtype (f32) for bit-closeness with torch.
    out_dtype: output feature dtype (f32 default; bf16 halves HBM writeback).
    """
    obs_dim = x.shape[1]
    act_dim = params["w1"].shape[0] - obs_dim
    B = x.shape[0]
    H1 = params["w1"].shape[1]
    H2 = params["w2"].shape[1]

    op_dtype = jnp.dtype(x.dtype if matmul_dtype is None else matmul_dtype)

    if discrete_action:
        # TODO(synk): for large discrete action spaces, prefetch the int ids
        # via PrefetchScalarGridSpec and row-select/add W1_act in-kernel
        # instead of materializing a [B, act_dim] one-hot array in HBM.
        action = jax.nn.one_hot(action.reshape(-1).astype(jnp.int32),
                                act_dim, dtype=op_dtype)

    # Split W1 once (static slice of a small weight; trivial cost).
    w1_obs = params["w1"][:obs_dim]
    w1_act = params["w1"][obs_dim:]
    b1, w2, b2 = params["b1"], params["w2"], params["b2"]

    x = x.astype(op_dtype)
    action = action.astype(op_dtype)
    w1_obs = w1_obs.astype(op_dtype)
    w1_act = w1_act.astype(op_dtype)
    w2 = w2.astype(op_dtype)
    # Biases stay f32: bias-add / ReLU happen on the f32 accumulator.

    # Batch tile: sublane multiple (16 for bf16 operands, 8 for f32), capped at
    # 1024 rows, and capped at ceil(B/2) so the "parallel" grid has at least 2
    # steps for the two TensorCores on v7x whenever B is big enough to split.
    sub = 8 * (4 // op_dtype.itemsize)
    if tm is None:
        if B <= sub:
            tm = B
        else:
            tm = max(sub, min(1024, _round_up(pl.cdiv(B, 2), sub)))

    grid = (pl.cdiv(B, tm),)

    out = pl.pallas_call(
        _mlp_kernel,
        out_shape=jax.ShapeDtypeStruct((B, H2), out_dtype),
        grid=grid,
        in_specs=[
            # batch-tiled activations (ragged last block handled by Pallas)
            pl.BlockSpec((tm, obs_dim), lambda i: (i, 0)),
            pl.BlockSpec((tm, act_dim), lambda i: (i, 0)),
            # weights/biases: constant index_map -> DMA'd once, VMEM-resident
            # across all batch tiles (no re-fetch when the block index repeats)
            pl.BlockSpec((obs_dim, H1), lambda i: (0, 0)),
            pl.BlockSpec((act_dim, H1), lambda i: (0, 0)),
            pl.BlockSpec((1, H1), lambda i: (0, 0)),
            pl.BlockSpec((H1, H2), lambda i: (0, 0)),
            pl.BlockSpec((1, H2), lambda i: (0, 0)),
        ],
        out_specs=pl.BlockSpec((tm, H2), lambda i: (i, 0)),
        compiler_params=pltpu.CompilerParams(
            dimension_semantics=("parallel",),
            vmem_limit_bytes=32 * 1024 * 1024,  # conservative for v7x's 64 MiB
        ),
    )(x, action, w1_obs, w1_act, b1, w2, b2)

    return out


# TODO(synk): use_batch_norm / dropout_rate / use_dense branches of
# _VectorEncoder are disabled in the default config and not implemented here.


def init_params(key, obs_dim, act_dim, hidden_units):
    """Deterministic init mimicking torch.nn.Linear (uniform +/- 1/sqrt(fan_in))."""
    in_dim = obs_dim + act_dim
    h1, h2 = hidden_units
    k1, k2, k3, k4 = jax.random.split(key, 4)
    lim1 = 1.0 / jnp.sqrt(in_dim)
    lim2 = 1.0 / jnp.sqrt(h1)
    return {
        "w1": jax.random.uniform(k1, (in_dim, h1), jnp.float32, -lim1, lim1),
        "b1": jax.random.uniform(k2, (1, h1), jnp.float32, -lim1, lim1),
        "w2": jax.random.uniform(k3, (h1, h2), jnp.float32, -lim2, lim2),
        "b2": jax.random.uniform(k4, (1, h2), jnp.float32, -lim2, lim2),
    }


def _reference(x, action, params):
    h = jnp.concatenate([x, action], axis=1)
    h = jnp.maximum(
        jnp.dot(h, params["w1"], precision=jax.lax.Precision.HIGHEST) + params["b1"], 0.0)
    h = jnp.maximum(
        jnp.dot(h, params["w2"], precision=jax.lax.Precision.HIGHEST) + params["b2"], 0.0)
    return h


if __name__ == "__main__":
    key = jax.random.PRNGKey(0)
    kx, ka, kp = jax.random.split(key, 3)

    B, OBS, ACT = 32, 16, 4
    HIDDEN = [256, 256]   # d3rlpy default hidden_units -> lane-dense tiles

    x = jax.random.normal(kx, (B, OBS), jnp.float32)
    action = jax.random.normal(ka, (B, ACT), jnp.float32)
    params = init_params(kp, OBS, ACT, HIDDEN)

    ref = _reference(x, action, params)

    # Default path: bf16 MXU operands, f32 accumulation/bias/ReLU, auto tile
    # (tm=16 -> grid=(2,), exercising the pipelined "parallel" path).
    out = jax.block_until_ready(vector_encoder_with_action(x, action, params))
    assert out.shape == (B, HIDDEN[-1]) and out.dtype == jnp.float32
    # Tolerance covers bf16-operand rounding (accumulation is f32).
    assert jnp.allclose(out, ref, atol=2e-2, rtol=2e-2), "bf16-operand path mismatch"

    # f32-operand path for bit-closeness with the torch reference.
    out32 = jax.block_until_ready(
        vector_encoder_with_action(x, action, params, matmul_dtype=None))
    assert jnp.allclose(out32, ref, atol=1e-3, rtol=1e-3), "f32 path mismatch"

    print("KERNEL_OK")
</pallas_src>

<mosaic_0001>
module attributes {stable_mosaic.version = 11 : i64} {
  func.func @_mlp_kernel(%arg0: i32, %arg1: memref<16x16xbf16, #tpu.memory_space<vmem>>, %arg2: memref<16x4xbf16, #tpu.memory_space<vmem>>, %arg3: memref<16x256xbf16, #tpu.memory_space<vmem>>, %arg4: memref<4x256xbf16, #tpu.memory_space<vmem>>, %arg5: memref<1x256xf32, #tpu.memory_space<vmem>>, %arg6: memref<256x256xbf16, #tpu.memory_space<vmem>>, %arg7: memref<1x256xf32, #tpu.memory_space<vmem>>, %arg8: memref<16x256xf32, #tpu.memory_space<vmem>>) attributes {dimension_semantics = [#tpu.dimension_semantics<parallel>], iteration_bounds = array<i64: 2>, scalar_prefetch = 0 : i64, scratch_operands = 0 : i64, tpu.core_type = #tpu.core_type<tc>, window_params = [{transform_indices = @transform_0, window_bounds = array<i64: 16, 16>}, {transform_indices = @transform_1, window_bounds = array<i64: 16, 4>}, {pipeline_mode = #tpu.pipeline_mode<synchronous>, transform_indices = @transform_2, window_bounds = array<i64: 16, 256>}, {pipeline_mode = #tpu.pipeline_mode<synchronous>, transform_indices = @transform_3, window_bounds = array<i64: 4, 256>}, {pipeline_mode = #tpu.pipeline_mode<synchronous>, transform_indices = @transform_4, window_bounds = array<i64: 1, 256>}, {pipeline_mode = #tpu.pipeline_mode<synchronous>, transform_indices = @transform_5, window_bounds = array<i64: 256, 256>}, {pipeline_mode = #tpu.pipeline_mode<synchronous>, transform_indices = @transform_6, window_bounds = array<i64: 1, 256>}, {transform_indices = @transform_7, window_bounds = array<i64: 16, 256>}]} {
    %c0 = arith.constant 0 : index
    %c0_0 = arith.constant 0 : index
    %0 = vector.load %arg1[%c0, %c0_0] : memref<16x16xbf16, #tpu.memory_space<vmem>>, vector<16x16xbf16>
    %c0_1 = arith.constant 0 : index
    %c0_2 = arith.constant 0 : index
    %1 = vector.load %arg3[%c0_1, %c0_2] : memref<16x256xbf16, #tpu.memory_space<vmem>>, vector<16x256xbf16>
    %cst = arith.constant dense<0.000000e+00> : vector<16x256xf32>
    %2 = tpu.matmul %0, %1, %cst {dimension_numbers = #tpu.dot_dimension_numbers<[1], [0], [0], [1], [0, 0, 1, 1], [], []>} : vector<16x16xbf16>, vector<16x256xbf16>, vector<16x256xf32> -> vector<16x256xf32>
    %c0_3 = arith.constant 0 : index
    %c0_4 = arith.constant 0 : index
    %3 = vector.load %arg2[%c0_3, %c0_4] : memref<16x4xbf16, #tpu.memory_space<vmem>>, vector<16x4xbf16>
    %c0_5 = arith.constant 0 : index
    %c0_6 = arith.constant 0 : index
    %4 = vector.load %arg4[%c0_5, %c0_6] : memref<4x256xbf16, #tpu.memory_space<vmem>>, vector<4x256xbf16>
    %cst_7 = arith.constant dense<0.000000e+00> : vector<16x256xf32>
    %5 = tpu.matmul %3, %4, %cst_7 {dimension_numbers = #tpu.dot_dimension_numbers<[1], [0], [0], [1], [0, 0, 1, 1], [], []>} : vector<16x4xbf16>, vector<4x256xbf16>, vector<16x256xf32> -> vector<16x256xf32>
    %6 = arith.addf %2, %5 : vector<16x256xf32>
    %c0_8 = arith.constant 0 : index
    %c0_9 = arith.constant 0 : index
    %7 = vector.load %arg5[%c0_8, %c0_9] : memref<1x256xf32, #tpu.memory_space<vmem>>, vector<1x256xf32>
    %8 = vector.broadcast %7 : vector<1x256xf32> to vector<16x256xf32>
    %9 = arith.addf %6, %8 : vector<16x256xf32>
    %cst_10 = arith.constant 0.000000e+00 : f32
    %10 = vector.broadcast %cst_10 : f32 to vector<16x256xf32>
    %11 = arith.maximumf %9, %10 : vector<16x256xf32>
    %12 = arith.truncf %11 : vector<16x256xf32> to vector<16x256xbf16>
    %c0_11 = arith.constant 0 : index
    %c0_12 = arith.constant 0 : index
    %13 = vector.load %arg6[%c0_11, %c0_12] : memref<256x256xbf16, #tpu.memory_space<vmem>>, vector<256x256xbf16>
    %cst_13 = arith.constant dense<0.000000e+00> : vector<16x256xf32>
    %14 = tpu.matmul %12, %13, %cst_13 {dimension_numbers = #tpu.dot_dimension_numbers<[1], [0], [0], [1], [0, 0, 1, 1], [], []>} : vector<16x256xbf16>, vector<256x256xbf16>, vector<16x256xf32> -> vector<16x256xf32>
    %c0_14 = arith.constant 0 : index
    %c0_15 = arith.constant 0 : index
    %15 = vector.load %arg7[%c0_14, %c0_15] : memref<1x256xf32, #tpu.memory_space<vmem>>, vector<1x256xf32>
    %16 = vector.broadcast %15 : vector<1x256xf32> to vector<16x256xf32>
    %17 = arith.addf %14, %16 : vector<16x256xf32>
    %cst_16 = arith.constant 0.000000e+00 : f32
    %18 = vector.broadcast %cst_16 : f32 to vector<16x256xf32>
    %19 = arith.maximumf %17, %18 : vector<16x256xf32>
    %c0_17 = arith.constant 0 : index
    %c0_18 = arith.constant 0 : index
    %20 = vector.load %arg8[%c0_17, %c0_18] : memref<16x256xf32, #tpu.memory_space<vmem>>, vector<16x256xf32>
    tpu.vector_store %arg8[%c0_17, %c0_18], %19 {strides = array<i32>} : memref<16x256xf32, #tpu.memory_space<vmem>>, vector<16x256xf32>,
    return
  }
  func.func @transform_0(%arg0: i32) -> (i32, i32) {
    %c0_i32 = arith.constant 0 : i32
    %c0_i32_0 = arith.constant 0 : i32
    return %arg0, %c0_i32 : i32, i32
  }
  func.func @transform_1(%arg0: i32) -> (i32, i32) {
    %c0_i32 = arith.constant 0 : i32
    %c0_i32_0 = arith.constant 0 : i32
    return %arg0, %c0_i32 : i32, i32
  }
  func.func @transform_2(%arg0: i32) -> (i32, i32) {
    %c0_i32 = arith.constant 0 : i32
    %c0_i32_0 = arith.constant 0 : i32
    %c0_i32_1 = arith.constant 0 : i32
    return %c0_i32, %c0_i32_0 : i32, i32
  }
  func.func @transform_3(%arg0: i32) -> (i32, i32) {
    %c0_i32 = arith.constant 0 : i32
    %c0_i32_0 = arith.constant 0 : i32
    %c0_i32_1 = arith.constant 0 : i32
    return %c0_i32, %c0_i32_0 : i32, i32
  }
  func.func @transform_4(%arg0: i32) -> (i32, i32) {
    %c0_i32 = arith.constant 0 : i32
    %c0_i32_0 = arith.constant 0 : i32
    %c0_i32_1 = arith.constant 0 : i32
    return %c0_i32, %c0_i32_0 : i32, i32
  }
  func.func @transform_5(%arg0: i32) -> (i32, i32) {
    %c0_i32 = arith.constant 0 : i32
    %c0_i32_0 = arith.constant 0 : i32
    %c0_i32_1 = arith.constant 0 : i32
    return %c0_i32, %c0_i32_0 : i32, i32
  }
  func.func @transform_6(%arg0: i32) -> (i32, i32) {
    %c0_i32 = arith.constant 0 : i32
    %c0_i32_0 = arith.constant 0 : i32
    %c0_i32_1 = arith.constant 0 : i32
    return %c0_i32, %c0_i32_0 : i32, i32
  }
  func.func @transform_7(%arg0: i32) -> (i32, i32) {
    %c0_i32 = arith.constant 0 : i32
    %c0_i32_0 = arith.constant 0 : i32
    return %arg0, %c0_i32 : i32, i32
  }
}

</mosaic_0001>

<bundles_post_ra>
// kernel: vector_encoder_with_action.1
= control target key start
LH: loop header
LB: loop body
LE: loop exit
PB: predicated region body
PF: predicated region fallthrough
CT: control target
= control target key end

     0   :  { %12 = vsyncpa [#allocation3], 0  ;;  %s1286_s0 = inlined_call_operand.vmem [shape: bf16[32,16], index: 0, kind: input, shape index: {}]   ;;  %s1287_s1 = inlined_call_operand.vmem [shape: bf16[32,4], index: 1, kind: input, shape index: {}]   ;;  %s1288_s2 = inlined_call_operand.vmem [shape: bf16[16,256], index: 2, kind: input, shape index: {}]   ;;  %s1289_s3 = inlined_call_operand.vmem [shape: bf16[4,256], index: 3, kind: input, shape index: {}]   ;;  %s1290_s4 = inlined_call_operand.vmem [shape: f32[1,256], index: 4, kind: input, shape index: {}]   ;;  %s1291_s5 = inlined_call_operand.vmem [shape: bf16[256,256], index: 5, kind: input, shape index: {}]   ;;  %s1292_s6 = inlined_call_operand.vmem [shape: f32[1,256], index: 6, kind: input, shape index: {}]   ;;  %s1293_s7 = inlined_call_operand.hbm [shape: f32[32,256], index: 7, kind: output, shape index: {}]  }
   0x1   :  { %14 = vsyncpa [#allocation3 + $0x1], 0  ;;  %s1070_s24 = smov 0   ;;  %s1072_s25 = smov 0  }
   0x2   :  { %s1074_s26 = smov 0   ;;  %s1076_s27 = smov 0  }
   0x3 LB: > { %s1091_s28 = sadd.s32 4294967295, %s1024_s27   ;;  %s806_s29 = sadd.s32 4294967294, %s1024_s27   ;;  %s1024_s27 = sphi %s1076_s27, %s1299_s27   ;;  %s1020_s26 = sphi %s1074_s26, %s1298_s26   ;;  %s1016_s25 = sphi %s1072_s25, %s1297_s25   ;;  %s1012_s24 = sphi %s1070_s24, %s1296_s24  }
   0x4   : > { %s1095_s30 = sadd.s32 1, %s1024_s27   ;;  %s184_s8 = sadd.s32 1, %s1020_s26 }
   0x5   : > { %s181_s9 = ssub.s32 %s1024_s27, %s1095_s30  ;;  %p194_p0 = scmp.ne.s32.totalorder %s1020_s26, %s1016_s25 }
   0x6   : > { %p182_p1 = scmp.eq.s32.totalorder %s181_s9, 0  ;;  %p195_p2 = scmp.eq.s32.totalorder %s1091_s28, 1 }
   0x7   : > { %p200_p3 = scmp.ne.s32.totalorder %s1016_s25, %s1012_s24  ;;  %p201_p4 = scmp.eq.s32.totalorder %s806_s29, 1 }
   0x8   : > { %s1106_s10 = scalar_select %p182_p1, %s1020_s26, %s184_s8  }
   0x9   : > { %p1108_p5 = por %p195_p2, %p194_p0  ;;  %p1112_p6 = por %p201_p4, %p200_p3 }
   0xa   : > { %p809_p7 = scmp.ge.s32.totalorder %s1024_s27, 1  ;;  %p252_p8 = scmp.lt.s32.totalorder %s1024_s27, 3 }
   0xc   : > { %p253_p9 = pnand %p809_p7, %p252_p8 }
   0xd   : > { %v816_v0 = vld.sshfl [vmem:[%s1289_s3] sm:$0x33 pattern:$0x76325410] (!%p253_p9)  ;;  %vm328_vm0 = vcmask (!%p253_p9), 1041408   ;;  %v1026_v3 = vmov (!%p253_p9), 0   ;;  %v442_v40 = vlaneseq (!%p253_p9) }
   0xe   : > { %256 = sbr.rel (%p253_p9) target bundleno = 493 (0x1ed), region = 48  ;;  %v323_v1 = vcombine.high (!%p253_p9), %v816_v0, %v816_v0  ;;  %v330_v2 = vsel (!%p253_p9), %vm328_vm0, %v816_v0, 0  ;;  %367 = vmatprep.mubr.bf16.mxu0 (!%p253_p9), %v1026_v3  ;;  %s811_s15 = sshll.u32 (!%p253_p9), %s1091_s28, 1  ;;  %v911_v4 = vld [vmem:[%s1288_s2 + $0x4] ss:$8 sps:$4 sm:$0xff] (!%p253_p9)   ;;  %vm324_vm1 = vcmask (!%p253_p9), 31744  }
   0xf   : > { %p290_p10 = scmp.lt.s32.totalorder (!%p253_p9), %s811_s15, 3  ;;  %v914_v5 = vld [vmem:[%s1291_s5 + $0x4] ss:$8 sps:$4 sm:$0xff] (!%p253_p9)   ;;  %v916_v6 = vld [vmem:[%s1291_s5] ss:$8 sps:$4 sm:$0xff] (!%p253_p9)   ;;  %vm393_vm2 = vcmask (!%p253_p9), 130048  }
  0x10   : > { %817 = vmatprep.subr.msk.bf16.mxu0 (!%p253_p9), %vm328_vm0, %v323_v1  ;;  %v917_v7 = vld [vmem:[%s1291_s5 + $0x14] ss:$8 sps:$4 sm:$0xff] (!%p253_p9)   ;;  %666 = vmatprep.subr.bf16.mxu1 (!%p253_p9), %v914_v5  ;;  %v919_v8 = vld [vmem:[%s1291_s5 + $0x10] ss:$8 sps:$4 sm:$0xff] (!%p253_p9)   ;;  %v909_v9 = vld [vmem:[%s1288_s2] ss:$8 sps:$4 sm:$0xff] (!%p253_p9)  }
  0x11   : > { %336 = vmatpush1.bf16.msra.mxu0 (!%p253_p9), %v330_v2  ;;  %667 = vmatpush1.bf16.msra.mxu1 (!%p253_p9), %v916_v6  ;;  %v920_v10 = vld [vmem:[%s1291_s5 + $0x24] ss:$8 sps:$4 sm:$0xff] (!%p253_p9)   ;;  %v922_v12 = vld [vmem:[%s1291_s5 + $0x20] ss:$8 sps:$4 sm:$0xff] (!%p253_p9)   ;;  %v923_v13 = vld [vmem:[%s1291_s5 + $0x34] ss:$8 sps:$4 sm:$0xff] (!%p253_p9)  }
  0x12   : > { %397 = vmatprep.subr.bf16.mxu0 (!%p253_p9), %v911_v4  ;;  %668 = vmatprep.subr.bf16.mxu1 (!%p253_p9), %v917_v7  ;;  %v925_v14 = vld [vmem:[%s1291_s5 + $0x30] ss:$8 sps:$4 sm:$0xff] (!%p253_p9)   ;;  %v926_v15 = vld [vmem:[%s1291_s5 + $0x44] ss:$8 sps:$4 sm:$0xff] (!%p253_p9)   ;;  %v928_v17 = vld [vmem:[%s1291_s5 + $0x40] ss:$8 sps:$4 sm:$0xff] (!%p253_p9)  }
  0x13   : > { %v929_v18 = vld [vmem:[%s1291_s5 + $0x54] ss:$8 sps:$4 sm:$0xff] (!%p253_p9)   ;;  %v931_v19 = vld [vmem:[%s1291_s5 + $0x50] ss:$8 sps:$4 sm:$0xff] (!%p253_p9)   ;;  %v932_v20 = vld [vmem:[%s1291_s5 + $0x64] ss:$8 sps:$4 sm:$0xff] (!%p253_p9)  }
  0x14   : > { %v934_v21 = vld [vmem:[%s1291_s5 + $0x60] ss:$8 sps:$4 sm:$0xff] (!%p253_p9)   ;;  %v935_v22 = vld [vmem:[%s1291_s5 + $0x74] ss:$8 sps:$4 sm:$0xff] (!%p253_p9)   ;;  %v937_v23 = vld [vmem:[%s1291_s5 + $0x70] ss:$8 sps:$4 sm:$0xff] (!%p253_p9)  }
  0x15   : > { %s1301_s15 = smov (!%p290_p10, %s811_s15), 3  ;;  %669 = vmatpush1.bf16.msra.mxu1 %v919_v8  ;;  %v938_v24 = vld [vmem:[%s1291_s5 + $0x84] ss:$8 sps:$4 sm:$0xff]   ;;  %v940_v25 = vld [vmem:[%s1291_s5 + $0x80] ss:$8 sps:$4 sm:$0xff]   ;;  %v443_v41 = vshrl.u32 %v442_v40, 7 }
  0x16   : > { %s812_s29 = sshll.u32 %s1301_s15, 2  ;;  %670 = vmatprep.subr.bf16.mxu1 %v920_v10  ;;  %v941_v26 = vld [vmem:[%s1291_s5 + $0x94] ss:$8 sps:$4 sm:$0xff]   ;;  %v943_v27 = vld [vmem:[%s1291_s5 + $0x90] ss:$8 sps:$4 sm:$0xff]   ;;  %s862_s16 = sshll.u32 %s1091_s28, 9 }
  0x17   : > { %s293_s18 = scalar_lea.vmem %s1286_s0, %s812_s29  ;;  %s299_s21 = scalar_lea.vmem %s1287_s1, %s812_s29  ;;  %v944_v28 = vld [vmem:[%s1291_s5 + $0xa4] ss:$8 sps:$4 sm:$0xff]   ;;  %v946_v29 = vld [vmem:[%s1291_s5 + $0xa0] ss:$8 sps:$4 sm:$0xff]   ;;  %v947_v30 = vld [vmem:[%s1291_s5 + $0xb4] ss:$8 sps:$4 sm:$0xff]  }
  0x18   : > { %v912_v11 = vld [vmem:[%s299_s21] sm:$0xff]   ;;  %v949_v31 = vld [vmem:[%s1291_s5 + $0xb0] ss:$8 sps:$4 sm:$0xff]   ;;  %v953_v34 = vld [vmem:[%s1291_s5 + $0xd4] ss:$8 sps:$4 sm:$0xff]   ;;  %v444_v42 = vsub.s32 0, %v443_v41  ;;  %s1243_s20 = scalar_lea.hbm %s1293_s7, %s862_s16 }
  0x19   : > { %818 = vmatmul.mubr.msk.bf16.vlgmr.msra.gmra.mrb[0].mxu0 %vm324_vm1, %v912_v11  ;;  %671 = vmatpush1.bf16.msra.mxu1 %v922_v12  ;;  %v913_v16 = vld [vmem:[%s293_s18] sm:$0xff]   ;;  %v955_v35 = vld [vmem:[%s1291_s5 + $0xd0] ss:$8 sps:$4 sm:$0xff]   ;;  %v959_v38 = vld [vmem:[%s1291_s5 + $0xf4] ss:$8 sps:$4 sm:$0xff]   ;;  %v448_v44 = vsub.s32 1, %v443_v41 }
  0x1a   : > { %398 = vmatpush1.bf16.msra.mxu0 %v909_v9  ;;  %429 = vmatprep.mubr.bf16.mxu0 %v1026_v3  ;;  %v950_v32 = vld [vmem:[%s1291_s5 + $0xc4] ss:$8 sps:$4 sm:$0xff]   ;;  %v952_v33 = vld [vmem:[%s1291_s5 + $0xc0] ss:$8 sps:$4 sm:$0xff]   ;;  %v961_v39 = vld [vmem:[%s1291_s5 + $0xf0] ss:$8 sps:$4 sm:$0xff]  }
  0x1b   : > { %672 = vmatprep.subr.bf16.mxu1 %v923_v13  ;;  %v956_v36 = vld [vmem:[%s1291_s5 + $0xe4] ss:$8 sps:$4 sm:$0xff]   ;;  %v958_v37 = vld [vmem:[%s1291_s5 + $0xe0] ss:$8 sps:$4 sm:$0xff]   ;;  %s286_s18 = sand.u32 1, %s1016_s25   ;;  %s1027_s15 = smov [#allocation2]  }
  0x1c   : > { %v440_v43 = vld [vmem:[%s1290_s4] sm:$0x3]  ;;  %s810_s13 = sshll.u32 %s286_s18, 5  ;;  %s1245_s28 = scalar_lea.sflag [#allocation3], %s286_s18 }
  0x1d   : > { %673 = vmatpush1.bf16.msra.mxu1 %v925_v14  ;;  %v445_v45 = vrot.slane %v440_v43, %v444_v42  ;;  %v449_v46 = vrot.slane %v440_v43, %v448_v44  ;;  %v494_v61 = vld [vmem:[%s1292_s6] sm:$0x3]  ;;  %s288_s29 = scalar_lea.vmem [#allocation2], %s810_s13  ;;  %s966_s22 = sshll.u32 %s1027_s15, 4  ;;  %s967_s22 = int_to_ptr.vmem [resolvable:$false] %s966_s22 }
  0x1e   : > { %674 = vmatprep.subr.bf16.mxu1 %v926_v15  ;;  %v499_v62 = vrot.slane %v494_v61, %v444_v42  ;;  %v503_v63 = vrot.slane %v494_v61, %v448_v44  ;;  %s732_s14 = sshll.u32 %s288_s29, 4  ;;  %s968_s23 = scalar_lea.vmem %s967_s22, 1024  ;;  %s1238_s14 = int_to_ptr.vmem [resolvable:$true] %s732_s14 }
  0x1f   : > { %s962_s21 = scalar_lea.vmem %s1238_s14, 512  ;;  %p969_p0 = scmp.lt.s32.totalorder %s1238_s14, %s967_s22 }
  0x20   : > { %p963_p11 = scmp.ne.s32.totalorder %s1238_s14, %s962_s21  ;;  %p970_p1 = scmp.lt.s32.totalorder %s968_s23, %s962_s21 }
  0x21   : > { %675 = vmatpush1.bf16.msra.mxu1 %v928_v17 }
  0x22   : > { %676 = vmatprep.subr.bf16.mxu1 %v929_v18  ;;  %p964_p12 = pnand %p963_p11, %p1108_p5  ;;  %p971_p2 = por %p970_p1, %p969_p0 }
  0x24   : > { %p965_p13 = pneg %p964_p12 }
  0x25   : > { %822 = vmatmul.mubr.msk.bf16.vlgmr.msra.gmra.mrb[0].mxu0 %vm393_vm2, %v913_v16  ;;  %677 = vmatpush1.bf16.msra.mxu1 %v931_v19 }
  0x26   : > { %678 = vmatprep.subr.bf16.mxu1 %v932_v20  ;;  %p972_p3 = pnand %p971_p2, %p965_p13 }
  0x29   : > { %679 = vmatpush1.bf16.msra.mxu1 %v934_v21 }
  0x2a   : > { %680 = vmatprep.subr.bf16.mxu1 %v935_v22 }
  0x2d   : > { %681 = vmatpush1.bf16.msra.mxu1 %v937_v23 }
  0x2e   : > { %682 = vmatprep.subr.bf16.mxu1 %v938_v24 }
  0x31   : > { %683 = vmatpush1.bf16.msra.mxu1 %v940_v25 }
  0x32   : > { %684 = vmatprep.subr.bf16.mxu1 %v941_v26 }
  0x35   : > { %685 = vmatpush1.bf16.msra.mxu1 %v943_v27 }
  0x36   : > { %686 = vmatprep.subr.bf16.mxu1 %v944_v28 }
  0x39   : > { %687 = vmatpush1.bf16.msra.mxu1 %v946_v29 }
  0x3a   : > { %688 = vmatprep.subr.bf16.mxu1 %v947_v30 }
  0x3d   : > { %689 = vmatpush1.bf16.msra.mxu1 %v949_v31 }
  0x3e   : > { %690 = vmatprep.subr.bf16.mxu1 %v950_v32 }
  0x41   : > { %691 = vmatpush1.bf16.msra.mxu1 %v952_v33 }
  0x42   : > { %692 = vmatprep.subr.bf16.mxu1 %v953_v34 }
  0x45   : > { %693 = vmatpush1.bf16.msra.mxu1 %v955_v35 }
  0x46   : > { %694 = vmatprep.subr.bf16.mxu1 %v956_v36 }
  0x49   : > { %695 = vmatpush1.bf16.msra.mxu1 %v958_v37 }
  0x4a   : > { %696 = vmatprep.subr.bf16.mxu1 %v959_v38 }
  0x4d   : > { %697 = vmatpush1.bf16.msra.mxu1 %v961_v39 }
  0xf8   : > { %v431_v47 = vpop.f32.mrb[0].mxu0 }
  0xf9   : > { %v452_v48 = vadd.f32 %v445_v45, %v431_v47  ;;  %v433_v49 = vpop.f32.mrb[1].mxu0 }
  0xfa   : > { %v453_v50 = vadd.f32 %v449_v46, %v433_v49  ;;  %v435_v51 = vpop.f32.mrb[2].mxu0 }
  0xfb   : > { %v454_v52 = vadd.f32 %v445_v45, %v435_v51  ;;  %v437_v53 = vpop.f32.mrb[3].mxu0  ;;  %v456_v55 = vmax.f32 %v452_v48, 0.0 }
  0xfc   : > { %v455_v54 = vadd.f32 %v449_v46, %v437_v53  ;;  %v457_v57 = vmax.f32 %v453_v50, 0.0 }
  0xfd   : > { %v458_v56 = vmax.f32 %v454_v52, 0.0 }
  0xfe   : > { %v459_v58 = vmax.f32 %v455_v54, 0.0 }
  0xff   : > { %v460_v59 = vpack.c.bf16 %v458_v56, %v456_v55 }
 0x100   : > { %v461_v60 = vpack.c.bf16 %v459_v58, %v457_v57 }
 0x102   : > { %698 = vmatprep.mubr.bf16.mxu1 %v461_v60 }
 0x103   : > { %699 = vmatmul.mubr.bf16.vlgmr.msra.gmra.mrb[0].mxu1 %v460_v59 }
 0x1d6   : > { %v700_v0 = vpop.f32.mrb[0].mxu1 }
 0x1d7   : > { %v701_v1 = vadd.f32 %v700_v0, %v499_v62  ;;  %v702_v2 = vpop.f32.mrb[1].mxu1 }
 0x1d8   : > { %v703_v3 = vadd.f32 %v702_v2, %v503_v63  ;;  %v704_v4 = vpop.f32.mrb[2].mxu1 }
 0x1d9   : > { %v709_v5 = vmax.f32 %v701_v1, 0.0  ;;  %v705_v6 = vadd.f32 %v704_v4, %v499_v62  ;;  %v706_v7 = vpop.f32.mrb[3].mxu1 }
 0x1da   : > { %v710_v8 = vmax.f32 %v703_v3, 0.0  ;;  %v707_v9 = vadd.f32 %v706_v7, %v503_v63 }
 0x1db   : > { %713 = vst [vmem:[%s288_s29] sm:$0xff] %v709_v5  ;;  %v711_v10 = vmax.f32 %v705_v6, 0.0 }
 0x1dc   : > { %714 = vst [vmem:[%s288_s29 + $0x8] sm:$0xff] %v710_v8  ;;  %v712_v11 = vmax.f32 %v707_v9, 0.0 }
 0x1dd   : > { %715 = vst [vmem:[%s288_s29 + $0x10] sm:$0xff] %v711_v10 }
 0x1de   : > { %716 = vst [vmem:[%s288_s29 + $0x18] sm:$0xff] %v712_v11 }
 0x1df   : > { %975 = shalt.err (!%p972_p3)
}
 0x1e0   : > { %s976_s8 = scalar_lea.hbm %s1243_s20, 512  ;;  %s980_s13 = scalar_lea.hbm %s1293_s7, 1024 }
 0x1e1   : > { %p977_p4 = scmp.ne.s32.totalorder %s1243_s20, %s976_s8  ;;  %p981_p9 = scmp.lt.u32.totalorder %s1243_s20, %s1293_s7 }
 0x1e2   : > { %p982_p10 = scmp.lt.u32.totalorder %s980_s13, %s976_s8  ;;  %p984_p12 = scmp.lt.u32.totalorder %s976_s8, %s1243_s20 }
 0x1e3   : > { %p978_p7 = pnand %p977_p4, %p1108_p5 }
 0x1e4   : > { %p983_p11 = por %p982_p10, %p981_p9 }
 0x1e5   : > { %p979_p8 = pneg %p978_p7 }
 0x1e6   : > { %p985_p13 = por %p984_p12, %p983_p11 }
 0x1e8   : > { %p986_p0 = pnand %p985_p13, %p979_p8 }
 0x1ea   : > { %989 = shalt.err (!%p986_p0)
}
 0x1eb   : > { %s1028_s17 = smov 256   ;;  %s1029_s19 = smov 16  }
 0x1ec   : > { %867 = dma.vmem_to_hbm [thread:$0]  (%p1108_p5), %s1238_s14, 512, %s1243_s20, %s1245_s28, %s1028_s17, %s1028_s17, %s1029_s19  }
 0x1ed PF: > { %p873_p1 = scmp.ge.s32.totalorder %s1024_s27, 2  ;;  %s747_s21 = sand.u32 1, %s1012_s24  }
 0x1ee   : > { %s748_s15 = scalar_lea.sflag [#allocation3], %s747_s21 }
 0x1ef   : > { %p870_p2 = pnand %p873_p1, %p1112_p6 }
 0x1f1   : > { %1007 = dma.done.wait (!%p870_p2), %s748_s15, 512  }
 0x1f2   : > { %1009 = vsyncadd (!%p870_p2), %s748_s15, 4294966784  ;;  %p17_p3 = scmp.ge.s32.totalorder %s1095_s30, 4   ;;  %s1296_s24 = smov %s1016_s25 }
 0x1f3   : > { %s1297_s25 = smov %s1020_s26  ;;  %s1298_s26 = smov %s1106_s10 }
 0x1f4   : > { %s1299_s27 = smov %s1095_s30  ;;  %19 = sbr.rel (!%p17_p3) target bundleno = 3 (0x3), region = 86 }
 0x1fb   :  { %753 = vsyncpa [#allocation3], 1 }
 0x1fc   :  { %755 = vsyncpa [#allocation3 + $0x1], 1 }

</bundles_post_ra>
